<compile_context>
chip_gen: v7x
topology: tpu7x:2x2x1
jax: 0.10.0
libtpu: 0.0.40
codegen_flags: <defaults>
</compile_context>

<pallas_src>
import jax
import jax.numpy as jnp
from jax import lax
from jax.experimental import pallas as pl
from jax.experimental.pallas import tpu as pltpu

_EPS = 1e-8
# filter_out_red thresholds (lower=[0,110,110], upper=[14,255,255]) with the
# x255 scaling and the /6 hue normalisation folded into the constants.
_HUE6_HI = 6.0 * 14.0 / 255.0   # hue (before /6) must be  <  this
_SAT_LO = 110.0 / 255.0         # saturation must be       >= this
_VAL_LO = 110.0 / 255.0         # value must be            >= this
# 3x3 Gaussian = outer([1/4,1/2,1/4],[1/4,1/2,1/4]); kernel uses the separable form.
_GAUSS_W = (
    (1.0 / 16, 1.0 / 8, 1.0 / 16),
    (1.0 / 8,  1.0 / 4, 1.0 / 8),
    (1.0 / 16, 1.0 / 8, 1.0 / 16),
)


def _hsv_red_mask(r, g, b):
    """Red-threshold mask of rgb_to_hsv (torch GML_mask semantics). f32 in/out."""
    mx = jnp.maximum(jnp.maximum(r, g), b)
    mn = jnp.minimum(jnp.minimum(r, g), b)
    inv_d = 1.0 / (mx - mn + _EPS)     # exact reciprocal, reused 3x
    inv_v = 1.0 / (mx + _EPS)          # exact reciprocal
    t = (g - b) * inv_d                # |t| < 1 wherever it is selected
    hue_r = jnp.where(t < 0.0, t + 6.0, t)        # == fmod(t, 6) for |t| < 6
    hue_g = 2.0 + (b - r) * inv_d
    hue_b = 4.0 + (r - g) * inv_d
    # torch priority: blue branch, then green, then red, then (min==max) -> 0.
    hue = hue_b
    hue = jnp.where(g == mx, hue_g, hue)
    hue = jnp.where(r == mx, hue_r, hue)
    hue = jnp.where(mn == mx, 0.0, hue)
    sat = jnp.where(mx == 0.0, 0.0, (mx - mn) * inv_v)
    val = mx
    # hue >= 0 is always true and dropped; upper sat/val checks kept (only matter
    # for out-of-range inputs, they cost one compare+and each).
    mask = ((hue < _HUE6_HI)
            & (sat >= _SAT_LO) & (sat <= 1.0)
            & (val >= _VAL_LO) & (val <= 1.0))
    return mask.astype(jnp.float32)


def _hotmap_strip_kernel(top_ref, mid_ref, bot_ref, o_ref):
    # top/bot blocks: (1, 3, HB, Wp) boundary bands; mid: (1, 3, TH, Wp);
    # o: (1, 1, TH, Wp).
    hi = pl.program_id(1)
    n_strips = pl.num_programs(1)
    TH, Wp = mid_ref.shape[2], mid_ref.shape[3]
    HB = top_ref.shape[2]

    # --- red mask for the centre strip --------------------------------------
    r = mid_ref[0, 0].astype(jnp.float32)
    g = mid_ref[0, 1].astype(jnp.float32)
    b = mid_ref[0, 2].astype(jnp.float32)
    m = _hsv_red_mask(r, g, b)                                        # (TH, Wp)

    # --- red mask for the 1-row halos (last row of the band above, first row
    #     of the band below); zeroed outside the image == conv zero padding.
    m_top = _hsv_red_mask(
        top_ref[0, 0, pl.ds(HB - 1, 1), :].astype(jnp.float32),
        top_ref[0, 1, pl.ds(HB - 1, 1), :].astype(jnp.float32),
        top_ref[0, 2, pl.ds(HB - 1, 1), :].astype(jnp.float32))       # (1, Wp)
    m_bot = _hsv_red_mask(
        bot_ref[0, 0, pl.ds(0, 1), :].astype(jnp.float32),
        bot_ref[0, 1, pl.ds(0, 1), :].astype(jnp.float32),
        bot_ref[0, 2, pl.ds(0, 1), :].astype(jnp.float32))            # (1, Wp)
    m_top = jnp.where(hi > 0, m_top, 0.0)
    m_bot = jnp.where(hi < n_strips - 1, m_bot, 0.0)

    # --- separable 3x3 Gaussian blur (roll + edge masking, no padded copy) ---
    row = lax.broadcasted_iota(jnp.int32, (TH, Wp), 0)
    up = jnp.where(row == 0, m_top, pltpu.roll(m, 1, axis=0))          # m[r-1]
    dn = jnp.where(row == TH - 1, m_bot, pltpu.roll(m, TH - 1, axis=0))  # m[r+1]
    v = 0.5 * m + 0.25 * (up + dn)                                     # vertical pass

    col = lax.broadcasted_iota(jnp.int32, (TH, Wp), 1)
    lf = jnp.where(col == 0, 0.0, pltpu.roll(v, 1, axis=1))            # v[:, c-1]
    rt = jnp.where(col == Wp - 1, 0.0, pltpu.roll(v, Wp - 1, axis=1))  # v[:, c+1]
    out = 0.5 * v + 0.25 * (lf + rt)                                   # horizontal pass

    o_ref[0, 0] = out.astype(o_ref.dtype)


def _tpu_vmem_capacity_bytes():
    try:
        return int(pltpu.get_tpu_info().vmem_capacity_bytes)
    except Exception:
        return None   # fall back to compiler defaults


def gml_mask_forward(x, *, target_rows=None):
    """x: (B, 3, H, W) float RGB image in [0, 1]. Returns (B, 1, H, W) hotmap."""
    B, C, H, W = x.shape
    assert C == 3, "GML_mask expects RGB input (C=3)"
    out_dtype = x.dtype

    # Lane-dense layout: pad W (lane axis) up to a multiple of 128.  Padded
    # pixels are zero => zero mask, so the blur at the true right edge still
    # behaves like the conv's zero padding; the pad is sliced off afterwards.
    Wp = W if W % 128 == 0 else (W // 128 + 1) * 128
    if Wp != W:
        x = jnp.pad(x, ((0, 0), (0, 0), (0, 0), (0, Wp - W)))

    vmem_cap = _tpu_vmem_capacity_bytes()

    # Strip height: a multiple of 8 (sublane tile) that divides H, sized so the
    # double-buffered 3-channel f32 input strip uses ~1/6 of this chip's VMEM
    # (bigger strips on 128 MiB v5e/v6e, smaller on 64 MiB v7x).
    if target_rows is None:
        cap_guess = vmem_cap if vmem_cap is not None else (64 << 20)
        bytes_per_row = 2 * 3 * 4 * Wp            # 2 buffers x 3 channels x f32
        target_rows = int(max(8, min(1024, (cap_guess // 6) // bytes_per_row)))

    if H % 8 == 0:
        HB = 8                                    # halo band height
        cap = max(8, min(H, target_rows))
        cap -= cap % 8
        TH = 8
        for cand in range(cap, 7, -8):            # largest multiple-of-8 divisor of H
            if H % cand == 0:
                TH = cand
                break
    else:
        # TODO(synk): H not a multiple of 8 falls back to one full-height strip.
        HB = H
        TH = H
    n_strips = H // TH
    bands_per_strip = TH // HB

    def top_map(bi, hi):      # band containing row (hi*TH - 1), clamped at the top
        return (bi, 0, jnp.maximum(hi * bands_per_strip - 1, 0), 0)

    def mid_map(bi, hi):
        return (bi, 0, hi, 0)

    def bot_map(bi, hi):      # band containing row ((hi+1)*TH), clamped at the bottom
        return (bi, 0, jnp.minimum((hi + 1) * bands_per_strip, H // HB - 1), 0)

    cp_kwargs = dict(dimension_semantics=("parallel", "parallel"))
    if vmem_cap is not None:
        cp_kwargs["vmem_limit_bytes"] = int(vmem_cap * 3 // 4)

    out = pl.pallas_call(
        _hotmap_strip_kernel,
        out_shape=jax.ShapeDtypeStruct((B, 1, H, Wp), out_dtype),
        grid_spec=pltpu.PrefetchScalarGridSpec(
            num_scalar_prefetch=0,
            grid=(B, n_strips),
            in_specs=[
                pl.BlockSpec((1, 3, HB, Wp), top_map),
                pl.BlockSpec((1, 3, TH, Wp), mid_map),
                pl.BlockSpec((1, 3, HB, Wp), bot_map),
            ],
            out_specs=pl.BlockSpec((1, 1, TH, Wp), lambda bi, hi: (bi, 0, hi, 0)),
        ),
        compiler_params=pltpu.CompilerParams(**cp_kwargs),
    )(x, x, x)
    return out if Wp == W else out[..., :W]


def _reference(x):
    """Dense pure-JAX reference of the same forward pass (for correctness)."""
    xf = x.astype(jnp.float32)
    mask = _hsv_red_mask(xf[:, 0], xf[:, 1], xf[:, 2])        # (B, H, W)
    p = jnp.pad(mask, ((0, 0), (1, 1), (1, 1)))
    B, H, W = mask.shape
    out = jnp.zeros((B, H, W), jnp.float32)
    for di in range(3):
        for dj in range(3):
            out = out + _GAUSS_W[di][dj] * p[:, di:di + H, dj:dj + W]
    return out[:, None].astype(x.dtype)


if __name__ == "__main__":
    key = jax.random.PRNGKey(0)
    B, C, H, W = 2, 3, 16, 16
    x = jax.random.uniform(key, (B, C, H, W), dtype=jnp.float32)
    # Deterministic red patch so the mask/blur are non-trivially exercised and
    # the patch straddles the strip boundary (row 8) used below.
    x = x.at[:, 0, 4:12, 4:12].set(0.95)
    x = x.at[:, 1, 4:12, 4:12].set(0.05)
    x = x.at[:, 2, 4:12, 4:12].set(0.05)

    ref = _reference(x)

    # Default (VMEM-sized) strips — a single strip at this tiny H.
    out = jax.block_until_ready(gml_mask_forward(x))
    assert out.shape == (B, 1, H, W), out.shape
    assert jnp.allclose(out, ref, atol=1e-5, rtol=1e-5), "mismatch (single strip)"

    # Force the multi-strip path: exercises halo bands + roll-based blur across
    # the strip boundary.
    out2 = jax.block_until_ready(gml_mask_forward(x, target_rows=8))
    assert jnp.allclose(out2, ref, atol=1e-5, rtol=1e-5), "mismatch (row strips)"

    print("KERNEL_OK")
</pallas_src>

<mosaic_0001>
module attributes {stable_mosaic.version = 11 : i64} {
  func.func @_hotmap_strip_kernel(%arg0: i32, %arg1: i32, %arg2: memref<1x3x8x128xf32, #tpu.memory_space<vmem>>, %arg3: memref<1x3x16x128xf32, #tpu.memory_space<vmem>>, %arg4: memref<1x3x8x128xf32, #tpu.memory_space<vmem>>, %arg5: memref<1x1x16x128xf32, #tpu.memory_space<vmem>>) attributes {dimension_semantics = [#tpu.dimension_semantics<parallel>, #tpu.dimension_semantics<parallel>], iteration_bounds = array<i64: 2, 1>, scalar_prefetch = 0 : i64, scratch_operands = 0 : i64, tpu.core_type = #tpu.core_type<tc>, window_params = [{transform_indices = @transform_0, window_bounds = array<i64: 1, 3, 8, 128>}, {transform_indices = @transform_1, window_bounds = array<i64: 1, 3, 16, 128>}, {transform_indices = @transform_2, window_bounds = array<i64: 1, 3, 8, 128>}, {transform_indices = @transform_3, window_bounds = array<i64: 1, 1, 16, 128>}]} {
    %c0 = arith.constant 0 : index
    %c0_0 = arith.constant 0 : index
    %c0_1 = arith.constant 0 : index
    %c0_2 = arith.constant 0 : index
    %0 = vector.load %arg3[%c0, %c0_0, %c0_1, %c0_2] : memref<1x3x16x128xf32, #tpu.memory_space<vmem>>, vector<1x1x16x128xf32>
    %1 = vector.shape_cast %0 : vector<1x1x16x128xf32> to vector<16x128xf32>
    %c0_3 = arith.constant 0 : index
    %c1 = arith.constant 1 : index
    %c0_4 = arith.constant 0 : index
    %c0_5 = arith.constant 0 : index
    %2 = vector.load %arg3[%c0_3, %c1, %c0_4, %c0_5] : memref<1x3x16x128xf32, #tpu.memory_space<vmem>>, vector<1x1x16x128xf32>
    %3 = vector.shape_cast %2 : vector<1x1x16x128xf32> to vector<16x128xf32>
    %c0_6 = arith.constant 0 : index
    %c2 = arith.constant 2 : index
    %c0_7 = arith.constant 0 : index
    %c0_8 = arith.constant 0 : index
    %4 = vector.load %arg3[%c0_6, %c2, %c0_7, %c0_8] : memref<1x3x16x128xf32, #tpu.memory_space<vmem>>, vector<1x1x16x128xf32>
    %5 = vector.shape_cast %4 : vector<1x1x16x128xf32> to vector<16x128xf32>
    %6 = arith.maximumf %1, %3 : vector<16x128xf32>
    %7 = arith.maximumf %6, %5 : vector<16x128xf32>
    %8 = arith.minimumf %1, %3 : vector<16x128xf32>
    %9 = arith.minimumf %8, %5 : vector<16x128xf32>
    %10 = arith.subf %7, %9 : vector<16x128xf32>
    %cst = arith.constant 9.99999993E-9 : f32
    %11 = vector.broadcast %cst : f32 to vector<16x128xf32>
    %12 = arith.addf %10, %11 : vector<16x128xf32>
    %cst_9 = arith.constant 1.000000e+00 : f32
    %13 = vector.broadcast %cst_9 : f32 to vector<16x128xf32>
    %14 = arith.divf %13, %12 : vector<16x128xf32>
    %cst_10 = arith.constant 9.99999993E-9 : f32
    %15 = vector.broadcast %cst_10 : f32 to vector<16x128xf32>
    %16 = arith.addf %7, %15 : vector<16x128xf32>
    %cst_11 = arith.constant 1.000000e+00 : f32
    %17 = vector.broadcast %cst_11 : f32 to vector<16x128xf32>
    %18 = arith.divf %17, %16 : vector<16x128xf32>
    %19 = arith.subf %3, %5 : vector<16x128xf32>
    %20 = arith.mulf %19, %14 : vector<16x128xf32>
    %cst_12 = arith.constant 0.000000e+00 : f32
    %21 = vector.broadcast %cst_12 : f32 to vector<16x128xf32>
    %22 = arith.cmpf olt, %20, %21 : vector<16x128xf32>
    %cst_13 = arith.constant 6.000000e+00 : f32
    %23 = vector.broadcast %cst_13 : f32 to vector<16x128xf32>
    %24 = arith.addf %20, %23 : vector<16x128xf32>
    %25 = arith.select %22, %24, %20 : vector<16x128xi1>, vector<16x128xf32>
    %26 = arith.subf %5, %1 : vector<16x128xf32>
    %27 = arith.mulf %26, %14 : vector<16x128xf32>
    %cst_14 = arith.constant 2.000000e+00 : f32
    %28 = vector.broadcast %cst_14 : f32 to vector<16x128xf32>
    %29 = arith.addf %28, %27 : vector<16x128xf32>
    %30 = arith.subf %1, %3 : vector<16x128xf32>
    %31 = arith.mulf %30, %14 : vector<16x128xf32>
    %cst_15 = arith.constant 4.000000e+00 : f32
    %32 = vector.broadcast %cst_15 : f32 to vector<16x128xf32>
    %33 = arith.addf %32, %31 : vector<16x128xf32>
    %34 = arith.cmpf oeq, %3, %7 : vector<16x128xf32>
    %35 = arith.select %34, %29, %33 : vector<16x128xi1>, vector<16x128xf32>
    %36 = arith.cmpf oeq, %1, %7 : vector<16x128xf32>
    %37 = arith.select %36, %25, %35 : vector<16x128xi1>, vector<16x128xf32>
    %38 = arith.cmpf oeq, %9, %7 : vector<16x128xf32>
    %cst_16 = arith.constant 0.000000e+00 : f32
    %39 = vector.broadcast %cst_16 : f32 to vector<16x128xf32>
    %40 = arith.select %38, %39, %37 : vector<16x128xi1>, vector<16x128xf32>
    %cst_17 = arith.constant 0.000000e+00 : f32
    %41 = vector.broadcast %cst_17 : f32 to vector<16x128xf32>
    %42 = arith.cmpf oeq, %7, %41 : vector<16x128xf32>
    %43 = arith.subf %7, %9 : vector<16x128xf32>
    %44 = arith.mulf %43, %18 : vector<16x128xf32>
    %cst_18 = arith.constant 0.000000e+00 : f32
    %45 = vector.broadcast %cst_18 : f32 to vector<16x128xf32>
    %46 = arith.select %42, %45, %44 : vector<16x128xi1>, vector<16x128xf32>
    %cst_19 = arith.constant 0.329411775 : f32
    %47 = vector.broadcast %cst_19 : f32 to vector<16x128xf32>
    %48 = arith.cmpf olt, %40, %47 : vector<16x128xf32>
    %cst_20 = arith.constant 0.431372553 : f32
    %49 = vector.broadcast %cst_20 : f32 to vector<16x128xf32>
    %50 = arith.cmpf oge, %46, %49 : vector<16x128xf32>
    %51 = arith.andi %48, %50 : vector<16x128xi1>
    %cst_21 = arith.constant 1.000000e+00 : f32
    %52 = vector.broadcast %cst_21 : f32 to vector<16x128xf32>
    %53 = arith.cmpf ole, %46, %52 : vector<16x128xf32>
    %54 = arith.andi %51, %53 : vector<16x128xi1>
    %cst_22 = arith.constant 0.431372553 : f32
    %55 = vector.broadcast %cst_22 : f32 to vector<16x128xf32>
    %56 = arith.cmpf oge, %7, %55 : vector<16x128xf32>
    %57 = arith.andi %54, %56 : vector<16x128xi1>
    %cst_23 = arith.constant 1.000000e+00 : f32
    %58 = vector.broadcast %cst_23 : f32 to vector<16x128xf32>
    %59 = arith.cmpf ole, %7, %58 : vector<16x128xf32>
    %60 = arith.andi %57, %59 : vector<16x128xi1>
    %61 = arith.extui %60 : vector<16x128xi1> to vector<16x128xi32>
    %62 = arith.sitofp %61 : vector<16x128xi32> to vector<16x128xf32>
    %c0_24 = arith.constant 0 : index
    %c0_25 = arith.constant 0 : index
    %c7 = arith.constant 7 : index
    %c0_26 = arith.constant 0 : index
    %63 = vector.load %arg2[%c0_24, %c0_25, %c7, %c0_26] : memref<1x3x8x128xf32, #tpu.memory_space<vmem>>, vector<1x1x1x128xf32>
    %64 = vector.shape_cast %63 : vector<1x1x1x128xf32> to vector<1x128xf32>
    %c0_27 = arith.constant 0 : index
    %c1_28 = arith.constant 1 : index
    %c7_29 = arith.constant 7 : index
    %c0_30 = arith.constant 0 : index
    %65 = vector.load %arg2[%c0_27, %c1_28, %c7_29, %c0_30] : memref<1x3x8x128xf32, #tpu.memory_space<vmem>>, vector<1x1x1x128xf32>
    %66 = vector.shape_cast %65 : vector<1x1x1x128xf32> to vector<1x128xf32>
    %c0_31 = arith.constant 0 : index
    %c2_32 = arith.constant 2 : index
    %c7_33 = arith.constant 7 : index
    %c0_34 = arith.constant 0 : index
    %67 = vector.load %arg2[%c0_31, %c2_32, %c7_33, %c0_34] : memref<1x3x8x128xf32, #tpu.memory_space<vmem>>, vector<1x1x1x128xf32>
    %68 = vector.shape_cast %67 : vector<1x1x1x128xf32> to vector<1x128xf32>
    %69 = arith.maximumf %64, %66 : vector<1x128xf32>
    %70 = arith.maximumf %69, %68 : vector<1x128xf32>
    %71 = arith.minimumf %64, %66 : vector<1x128xf32>
    %72 = arith.minimumf %71, %68 : vector<1x128xf32>
    %73 = arith.subf %70, %72 : vector<1x128xf32>
    %cst_35 = arith.constant 9.99999993E-9 : f32
    %74 = vector.broadcast %cst_35 : f32 to vector<1x128xf32>
    %75 = arith.addf %73, %74 : vector<1x128xf32>
    %cst_36 = arith.constant 1.000000e+00 : f32
    %76 = vector.broadcast %cst_36 : f32 to vector<1x128xf32>
    %77 = arith.divf %76, %75 : vector<1x128xf32>
    %cst_37 = arith.constant 9.99999993E-9 : f32
    %78 = vector.broadcast %cst_37 : f32 to vector<1x128xf32>
    %79 = arith.addf %70, %78 : vector<1x128xf32>
    %cst_38 = arith.constant 1.000000e+00 : f32
    %80 = vector.broadcast %cst_38 : f32 to vector<1x128xf32>
    %81 = arith.divf %80, %79 : vector<1x128xf32>
    %82 = arith.subf %66, %68 : vector<1x128xf32>
    %83 = arith.mulf %82, %77 : vector<1x128xf32>
    %cst_39 = arith.constant 0.000000e+00 : f32
    %84 = vector.broadcast %cst_39 : f32 to vector<1x128xf32>
    %85 = arith.cmpf olt, %83, %84 : vector<1x128xf32>
    %cst_40 = arith.constant 6.000000e+00 : f32
    %86 = vector.broadcast %cst_40 : f32 to vector<1x128xf32>
    %87 = arith.addf %83, %86 : vector<1x128xf32>
    %88 = arith.select %85, %87, %83 : vector<1x128xi1>, vector<1x128xf32>
    %89 = arith.subf %68, %64 : vector<1x128xf32>
    %90 = arith.mulf %89, %77 : vector<1x128xf32>
    %cst_41 = arith.constant 2.000000e+00 : f32
    %91 = vector.broadcast %cst_41 : f32 to vector<1x128xf32>
    %92 = arith.addf %91, %90 : vector<1x128xf32>
    %93 = arith.subf %64, %66 : vector<1x128xf32>
    %94 = arith.mulf %93, %77 : vector<1x128xf32>
    %cst_42 = arith.constant 4.000000e+00 : f32
    %95 = vector.broadcast %cst_42 : f32 to vector<1x128xf32>
    %96 = arith.addf %95, %94 : vector<1x128xf32>
    %97 = arith.cmpf oeq, %66, %70 : vector<1x128xf32>
    %98 = arith.select %97, %92, %96 : vector<1x128xi1>, vector<1x128xf32>
    %99 = arith.cmpf oeq, %64, %70 : vector<1x128xf32>
    %100 = arith.select %99, %88, %98 : vector<1x128xi1>, vector<1x128xf32>
    %101 = arith.cmpf oeq, %72, %70 : vector<1x128xf32>
    %cst_43 = arith.constant 0.000000e+00 : f32
    %102 = vector.broadcast %cst_43 : f32 to vector<1x128xf32>
    %103 = arith.select %101, %102, %100 : vector<1x128xi1>, vector<1x128xf32>
    %cst_44 = arith.constant 0.000000e+00 : f32
    %104 = vector.broadcast %cst_44 : f32 to vector<1x128xf32>
    %105 = arith.cmpf oeq, %70, %104 : vector<1x128xf32>
    %106 = arith.subf %70, %72 : vector<1x128xf32>
    %107 = arith.mulf %106, %81 : vector<1x128xf32>
    %cst_45 = arith.constant 0.000000e+00 : f32
    %108 = vector.broadcast %cst_45 : f32 to vector<1x128xf32>
    %109 = arith.select %105, %108, %107 : vector<1x128xi1>, vector<1x128xf32>
    %cst_46 = arith.constant 0.329411775 : f32
    %110 = vector.broadcast %cst_46 : f32 to vector<1x128xf32>
    %111 = arith.cmpf olt, %103, %110 : vector<1x128xf32>
    %cst_47 = arith.constant 0.431372553 : f32
    %112 = vector.broadcast %cst_47 : f32 to vector<1x128xf32>
    %113 = arith.cmpf oge, %109, %112 : vector<1x128xf32>
    %114 = arith.andi %111, %113 : vector<1x128xi1>
    %cst_48 = arith.constant 1.000000e+00 : f32
    %115 = vector.broadcast %cst_48 : f32 to vector<1x128xf32>
    %116 = arith.cmpf ole, %109, %115 : vector<1x128xf32>
    %117 = arith.andi %114, %116 : vector<1x128xi1>
    %cst_49 = arith.constant 0.431372553 : f32
    %118 = vector.broadcast %cst_49 : f32 to vector<1x128xf32>
    %119 = arith.cmpf oge, %70, %118 : vector<1x128xf32>
    %120 = arith.andi %117, %119 : vector<1x128xi1>
    %cst_50 = arith.constant 1.000000e+00 : f32
    %121 = vector.broadcast %cst_50 : f32 to vector<1x128xf32>
    %122 = arith.cmpf ole, %70, %121 : vector<1x128xf32>
    %123 = arith.andi %120, %122 : vector<1x128xi1>
    %124 = arith.extui %123 : vector<1x128xi1> to vector<1x128xi32>
    %125 = arith.sitofp %124 : vector<1x128xi32> to vector<1x128xf32>
    %c0_51 = arith.constant 0 : index
    %c0_52 = arith.constant 0 : index
    %c0_53 = arith.constant 0 : index
    %c0_54 = arith.constant 0 : index
    %126 = vector.load %arg4[%c0_51, %c0_52, %c0_53, %c0_54] : memref<1x3x8x128xf32, #tpu.memory_space<vmem>>, vector<1x1x1x128xf32>
    %127 = vector.shape_cast %126 : vector<1x1x1x128xf32> to vector<1x128xf32>
    %c0_55 = arith.constant 0 : index
    %c1_56 = arith.constant 1 : index
    %c0_57 = arith.constant 0 : index
    %c0_58 = arith.constant 0 : index
    %128 = vector.load %arg4[%c0_55, %c1_56, %c0_57, %c0_58] : memref<1x3x8x128xf32, #tpu.memory_space<vmem>>, vector<1x1x1x128xf32>
    %129 = vector.shape_cast %128 : vector<1x1x1x128xf32> to vector<1x128xf32>
    %c0_59 = arith.constant 0 : index
    %c2_60 = arith.constant 2 : index
    %c0_61 = arith.constant 0 : index
    %c0_62 = arith.constant 0 : index
    %130 = vector.load %arg4[%c0_59, %c2_60, %c0_61, %c0_62] : memref<1x3x8x128xf32, #tpu.memory_space<vmem>>, vector<1x1x1x128xf32>
    %131 = vector.shape_cast %130 : vector<1x1x1x128xf32> to vector<1x128xf32>
    %132 = arith.maximumf %127, %129 : vector<1x128xf32>
    %133 = arith.maximumf %132, %131 : vector<1x128xf32>
    %134 = arith.minimumf %127, %129 : vector<1x128xf32>
    %135 = arith.minimumf %134, %131 : vector<1x128xf32>
    %136 = arith.subf %133, %135 : vector<1x128xf32>
    %cst_63 = arith.constant 9.99999993E-9 : f32
    %137 = vector.broadcast %cst_63 : f32 to vector<1x128xf32>
    %138 = arith.addf %136, %137 : vector<1x128xf32>
    %cst_64 = arith.constant 1.000000e+00 : f32
    %139 = vector.broadcast %cst_64 : f32 to vector<1x128xf32>
    %140 = arith.divf %139, %138 : vector<1x128xf32>
    %cst_65 = arith.constant 9.99999993E-9 : f32
    %141 = vector.broadcast %cst_65 : f32 to vector<1x128xf32>
    %142 = arith.addf %133, %141 : vector<1x128xf32>
    %cst_66 = arith.constant 1.000000e+00 : f32
    %143 = vector.broadcast %cst_66 : f32 to vector<1x128xf32>
    %144 = arith.divf %143, %142 : vector<1x128xf32>
    %145 = arith.subf %129, %131 : vector<1x128xf32>
    %146 = arith.mulf %145, %140 : vector<1x128xf32>
    %cst_67 = arith.constant 0.000000e+00 : f32
    %147 = vector.broadcast %cst_67 : f32 to vector<1x128xf32>
    %148 = arith.cmpf olt, %146, %147 : vector<1x128xf32>
    %cst_68 = arith.constant 6.000000e+00 : f32
    %149 = vector.broadcast %cst_68 : f32 to vector<1x128xf32>
    %150 = arith.addf %146, %149 : vector<1x128xf32>
    %151 = arith.select %148, %150, %146 : vector<1x128xi1>, vector<1x128xf32>
    %152 = arith.subf %131, %127 : vector<1x128xf32>
    %153 = arith.mulf %152, %140 : vector<1x128xf32>
    %cst_69 = arith.constant 2.000000e+00 : f32
    %154 = vector.broadcast %cst_69 : f32 to vector<1x128xf32>
    %155 = arith.addf %154, %153 : vector<1x128xf32>
    %156 = arith.subf %127, %129 : vector<1x128xf32>
    %157 = arith.mulf %156, %140 : vector<1x128xf32>
    %cst_70 = arith.constant 4.000000e+00 : f32
    %158 = vector.broadcast %cst_70 : f32 to vector<1x128xf32>
    %159 = arith.addf %158, %157 : vector<1x128xf32>
    %160 = arith.cmpf oeq, %129, %133 : vector<1x128xf32>
    %161 = arith.select %160, %155, %159 : vector<1x128xi1>, vector<1x128xf32>
    %162 = arith.cmpf oeq, %127, %133 : vector<1x128xf32>
    %163 = arith.select %162, %151, %161 : vector<1x128xi1>, vector<1x128xf32>
    %164 = arith.cmpf oeq, %135, %133 : vector<1x128xf32>
    %cst_71 = arith.constant 0.000000e+00 : f32
    %165 = vector.broadcast %cst_71 : f32 to vector<1x128xf32>
    %166 = arith.select %164, %165, %163 : vector<1x128xi1>, vector<1x128xf32>
    %cst_72 = arith.constant 0.000000e+00 : f32
    %167 = vector.broadcast %cst_72 : f32 to vector<1x128xf32>
    %168 = arith.cmpf oeq, %133, %167 : vector<1x128xf32>
    %169 = arith.subf %133, %135 : vector<1x128xf32>
    %170 = arith.mulf %169, %144 : vector<1x128xf32>
    %cst_73 = arith.constant 0.000000e+00 : f32
    %171 = vector.broadcast %cst_73 : f32 to vector<1x128xf32>
    %172 = arith.select %168, %171, %170 : vector<1x128xi1>, vector<1x128xf32>
    %cst_74 = arith.constant 0.329411775 : f32
    %173 = vector.broadcast %cst_74 : f32 to vector<1x128xf32>
    %174 = arith.cmpf olt, %166, %173 : vector<1x128xf32>
    %cst_75 = arith.constant 0.431372553 : f32
    %175 = vector.broadcast %cst_75 : f32 to vector<1x128xf32>
    %176 = arith.cmpf oge, %172, %175 : vector<1x128xf32>
    %177 = arith.andi %174, %176 : vector<1x128xi1>
    %cst_76 = arith.constant 1.000000e+00 : f32
    %178 = vector.broadcast %cst_76 : f32 to vector<1x128xf32>
    %179 = arith.cmpf ole, %172, %178 : vector<1x128xf32>
    %180 = arith.andi %177, %179 : vector<1x128xi1>
    %cst_77 = arith.constant 0.431372553 : f32
    %181 = vector.broadcast %cst_77 : f32 to vector<1x128xf32>
    %182 = arith.cmpf oge, %133, %181 : vector<1x128xf32>
    %183 = arith.andi %180, %182 : vector<1x128xi1>
    %cst_78 = arith.constant 1.000000e+00 : f32
    %184 = vector.broadcast %cst_78 : f32 to vector<1x128xf32>
    %185 = arith.cmpf ole, %133, %184 : vector<1x128xf32>
    %186 = arith.andi %183, %185 : vector<1x128xi1>
    %187 = arith.extui %186 : vector<1x128xi1> to vector<1x128xi32>
    %188 = arith.sitofp %187 : vector<1x128xi32> to vector<1x128xf32>
    %c0_i32 = arith.constant 0 : i32
    %189 = arith.cmpi sgt, %arg1, %c0_i32 : i32
    %cst_79 = arith.constant 0.000000e+00 : f32
    %190 = vector.broadcast %cst_79 : f32 to vector<1x128xf32>
    %191 = arith.select %189, %125, %190 : vector<1x128xf32>
    %c0_i32_80 = arith.constant 0 : i32
    %192 = arith.cmpi slt, %arg1, %c0_i32_80 : i32
    %cst_81 = arith.constant 0.000000e+00 : f32
    %193 = vector.broadcast %cst_81 : f32 to vector<1x128xf32>
    %194 = arith.select %192, %188, %193 : vector<1x128xf32>
    %195 = tpu.iota {dimensions = array<i32: 0>} : vector<16x128xi32>
    %c0_i32_82 = arith.constant 0 : i32
    %196 = vector.broadcast %c0_i32_82 : i32 to vector<16x128xi32>
    %197 = arith.cmpi eq, %195, %196 : vector<16x128xi32>
    %c1_i32 = arith.constant 1 : i32
    %198 = tpu.dynamic_rotate %62 by %c1_i32 dim 0 : vector<16x128xf32>, i32 -> vector<16x128xf32>
    %199 = vector.shape_cast %191 : vector<1x128xf32> to vector<1x128xf32>
    %200 = vector.broadcast %199 : vector<1x128xf32> to vector<16x128xf32>
    %201 = arith.select %197, %200, %198 : vector<16x128xi1>, vector<16x128xf32>
    %c15_i32 = arith.constant 15 : i32
    %202 = vector.broadcast %c15_i32 : i32 to vector<16x128xi32>
    %203 = arith.cmpi eq, %195, %202 : vector<16x128xi32>
    %c15_i32_83 = arith.constant 15 : i32
    %204 = tpu.dynamic_rotate %62 by %c15_i32_83 dim 0 : vector<16x128xf32>, i32 -> vector<16x128xf32>
    %205 = vector.shape_cast %194 : vector<1x128xf32> to vector<1x128xf32>
    %206 = vector.broadcast %205 : vector<1x128xf32> to vector<16x128xf32>
    %207 = arith.select %203, %206, %204 : vector<16x128xi1>, vector<16x128xf32>
    %cst_84 = arith.constant 5.000000e-01 : f32
    %208 = vector.broadcast %cst_84 : f32 to vector<16x128xf32>
    %209 = arith.mulf %208, %62 : vector<16x128xf32>
    %210 = arith.addf %201, %207 : vector<16x128xf32>
    %cst_85 = arith.constant 2.500000e-01 : f32
    %211 = vector.broadcast %cst_85 : f32 to vector<16x128xf32>
    %212 = arith.mulf %211, %210 : vector<16x128xf32>
    %213 = arith.addf %209, %212 : vector<16x128xf32>
    %214 = tpu.iota {dimensions = array<i32: 1>} : vector<16x128xi32>
    %c0_i32_86 = arith.constant 0 : i32
    %215 = vector.broadcast %c0_i32_86 : i32 to vector<16x128xi32>
    %216 = arith.cmpi eq, %214, %215 : vector<16x128xi32>
    %c1_i32_87 = arith.constant 1 : i32
    %217 = tpu.dynamic_rotate %213 by %c1_i32_87 dim 1 : vector<16x128xf32>, i32 -> vector<16x128xf32>
    %cst_88 = arith.constant 0.000000e+00 : f32
    %218 = vector.broadcast %cst_88 : f32 to vector<16x128xf32>
    %219 = arith.select %216, %218, %217 : vector<16x128xi1>, vector<16x128xf32>
    %c127_i32 = arith.constant 127 : i32
    %220 = vector.broadcast %c127_i32 : i32 to vector<16x128xi32>
    %221 = arith.cmpi eq, %214, %220 : vector<16x128xi32>
    %c127_i32_89 = arith.constant 127 : i32
    %222 = tpu.dynamic_rotate %213 by %c127_i32_89 dim 1 : vector<16x128xf32>, i32 -> vector<16x128xf32>
    %cst_90 = arith.constant 0.000000e+00 : f32
    %223 = vector.broadcast %cst_90 : f32 to vector<16x128xf32>
    %224 = arith.select %221, %223, %222 : vector<16x128xi1>, vector<16x128xf32>
    %cst_91 = arith.constant 5.000000e-01 : f32
    %225 = vector.broadcast %cst_91 : f32 to vector<16x128xf32>
    %226 = arith.mulf %225, %213 : vector<16x128xf32>
    %227 = arith.addf %219, %224 : vector<16x128xf32>
    %cst_92 = arith.constant 2.500000e-01 : f32
    %228 = vector.broadcast %cst_92 : f32 to vector<16x128xf32>
    %229 = arith.mulf %228, %227 : vector<16x128xf32>
    %230 = arith.addf %226, %229 : vector<16x128xf32>
    %c0_93 = arith.constant 0 : index
    %c0_94 = arith.constant 0 : index
    %c0_95 = arith.constant 0 : index
    %c0_96 = arith.constant 0 : index
    %231 = vector.load %arg5[%c0_93, %c0_94, %c0_95, %c0_96] : memref<1x1x16x128xf32, #tpu.memory_space<vmem>>, vector<1x1x16x128xf32>
    %232 = vector.shape_cast %231 : vector<1x1x16x128xf32> to vector<16x128xf32>
    %233 = vector.shape_cast %230 : vector<16x128xf32> to vector<1x1x16x128xf32>
    tpu.vector_store %arg5[%c0_93, %c0_94, %c0_95, %c0_96], %233 {strides = array<i32>} : memref<1x1x16x128xf32, #tpu.memory_space<vmem>>, vector<1x1x16x128xf32>,
    return
  }
  func.func @transform_0(%arg0: i32, %arg1: i32) -> (i32, i32, i32, i32) {
    %c2_i32 = arith.constant 2 : i32
    %0 = arith.muli %arg1, %c2_i32 : i32
    %c1_i32 = arith.constant 1 : i32
    %1 = arith.subi %0, %c1_i32 : i32
    %c0_i32 = arith.constant 0 : i32
    %2 = arith.maxsi %1, %c0_i32 : i32
    %c0_i32_0 = arith.constant 0 : i32
    %c0_i32_1 = arith.constant 0 : i32
    %c0_i32_2 = arith.constant 0 : i32
    return %arg0, %c0_i32_0, %2, %c0_i32_1 : i32, i32, i32, i32
  }
  func.func @transform_1(%arg0: i32, %arg1: i32) -> (i32, i32, i32, i32) {
    %c0_i32 = arith.constant 0 : i32
    %c0_i32_0 = arith.constant 0 : i32
    %c0_i32_1 = arith.constant 0 : i32
    return %arg0, %c0_i32, %arg1, %c0_i32_0 : i32, i32, i32, i32
  }
  func.func @transform_2(%arg0: i32, %arg1: i32) -> (i32, i32, i32, i32) {
    %c1_i32 = arith.constant 1 : i32
    %0 = arith.addi %arg1, %c1_i32 : i32
    %c2_i32 = arith.constant 2 : i32
    %1 = arith.muli %0, %c2_i32 : i32
    %c1_i32_0 = arith.constant 1 : i32
    %2 = arith.minsi %1, %c1_i32_0 : i32
    %c0_i32 = arith.constant 0 : i32
    %c0_i32_1 = arith.constant 0 : i32
    %c0_i32_2 = arith.constant 0 : i32
    return %arg0, %c0_i32, %2, %c0_i32_1 : i32, i32, i32, i32
  }
  func.func @transform_3(%arg0: i32, %arg1: i32) -> (i32, i32, i32, i32) {
    %c0_i32 = arith.constant 0 : i32
    %c0_i32_0 = arith.constant 0 : i32
    %c0_i32_1 = arith.constant 0 : i32
    return %arg0, %c0_i32, %arg1, %c0_i32_0 : i32, i32, i32, i32
  }
}

</mosaic_0001>

<bundles_post_ra>
// kernel: tpu_custom_call.1
= control target key start
LH: loop header
LB: loop body
LE: loop exit
PB: predicated region body
PF: predicated region fallthrough
CT: control target
= control target key end

     0   :  { %s1396_s0 = inlined_call_operand.hbm [shape: f32[2,3,16,128], index: 0, kind: input, shape index: {}]   ;;  %s1397_s1 = inlined_call_operand.hbm [shape: f32[2,3,16,128], index: 1, kind: input, shape index: {}]   ;;  %s1398_s2 = inlined_call_operand.hbm [shape: f32[2,3,16,128], index: 2, kind: input, shape index: {}]   ;;  %s1399_s3 = inlined_call_operand.hbm [shape: f32[2,1,16,128], index: 3, kind: output, shape index: {}]  }
   0x1   :  { %1406 = sst [smem:[#allocation15_spill]] %s1396_s0 }
   0x2   :  { %1407 = sst [smem:[#allocation16_spill]] %s1397_s1 }
   0x3   :  { %8 = vsyncpa [#allocation3], 0 }
   0x4   :  { %10 = vsyncpa [#allocation3 + $0x1], 0 }
   0x5   :  { %11 = vsyncpa [#allocation6], 0 }
   0x6   :  { %13 = vsyncpa [#allocation6 + $0x1], 0 }
   0x7   :  { %14 = vsyncpa [#allocation4], 0 }
   0x8   :  { %16 = vsyncpa [#allocation4 + $0x1], 0  ;;  %s1068_s12 = smov 0   ;;  %s1070_s13 = smov 0  }
   0x9   :  { %s1072_s14 = smov 0   ;;  %s1074_s15 = smov 0  }
   0xa   :  { %s1076_s16 = smov 0   ;;  %s1078_s17 = smov 0  }
   0xb LB: > { %1408 = sst [smem:[#allocation12_spill]] %s1030_s16  ;;  %s1099_s18 = sadd.s32 4294967295, %s1034_s17   ;;  %s1034_s17 = sphi %s1078_s17, %s22_s17   ;;  %s1030_s16 = sphi %s1076_s16, %s1430_s16   ;;  %s1026_s15 = sphi %s1074_s15, %s1429_s15   ;;  %s1022_s14 = sphi %s1072_s14, %s1433_s14   ;;  %s1018_s13 = sphi %s1070_s13, %s1432_s13   ;;  %s1014_s12 = sphi %s1068_s12, %s1431_s12  }
   0xc   : > { %s734_s19 = sadd.s32 4294967294, %s1034_s17   ;;  %s34_s20 = sadd.s32 1, %s1030_s16 }
   0xd   : > { %s51_s21 = sadd.s32 1, %s1022_s14  ;;  %p36_p0 = scmp.ge.s32.totalorder %s34_s20, 2 }
   0xe   : > { %p58_p1 = scmp.ne.s32.totalorder %s1022_s14, %s1018_s13  ;;  %p59_p2 = scmp.eq.s32.totalorder %s1034_s17, 0 }
   0xf   : > { %p64_p3 = scmp.ne.s32.totalorder %s1018_s13, %s1014_s12  ;;  %s1435_s20 = smov (%p36_p0, %s34_s20), 0 }
  0x10   : > { %1409 = sst [smem:[#allocation13_spill]] %s1435_s20  ;;  %p1111_p4 = por %p59_p2, %p58_p1 }
  0x11   : > { %p65_p5 = scmp.eq.s32.totalorder %s1099_s18, 0  ;;  %s46_s23 = ssub.s32 %s1030_s16, %s1435_s20 }
  0x12   : > { %p154_p6 = scmp.eq.s32.totalorder %s1099_s18, 1  ;;  %p49_p7 = scmp.eq.s32.totalorder %s46_s23, 0 }
  0x13   : > { %p1119_p8 = por %p65_p5, %p64_p3  ;;  %p160_p10 = scmp.eq.s32.totalorder %s734_s19, 1 }
  0x14   : > { %p1123_p9 = por %p154_p6, %p58_p1  ;;  %p791_p13 = scmp.lt.s32.totalorder %s1034_s17, 2 }
  0x15   : > { %s1411_s24 = scalar_select %p1119_p8, 1, 0 }
  0x16   : > { %s1412_s25 = scalar_select %p1123_p9, 1, 0 }
  0x17   : > { %s1128_s26 = scalar_select %p49_p7, %s1022_s14, %s51_s21  }
  0x18   : > { %p1130_p11 = por %p160_p10, %p64_p3  ;;  %s1137_s28 = sand.u32 1, %s1022_s14  }
  0x19   : > { %1413 = sst [smem:[#allocation14_spill]] %s1128_s26  ;;  %s1141_s30 = smul.u32 768, %s1030_s16 }
  0x1a   : > { %s1414_s27 = scalar_select %p1130_p11, 1, 0 }
  0x1b   : > { %p1145_p0 = pnand %p791_p13, %p1111_p4  ;;  %s206_s5 = sand.u32 1, %s1034_s17  }
  0x1c   : > { %s764_s6 = smul.u32 48, %s1137_s28  ;;  %s1416_s1 = sld [smem:[#allocation16_spill]] }
  0x1d   : > { %p740_p1 = scmp.ge.s32.totalorder %s1034_s17, 1  ;;  %p253_p2 = scmp.lt.s32.totalorder %s1034_s17, 3 }
  0x1e   : > { %s210_s10 = scalar_lea.vmem [#allocation5], %s764_s6  ;;  %s1165_s21 = scalar_lea.sflag [#allocation6], %s206_s5 }
  0x1f   : > { %s219_s11 = sshll.u32 %s210_s10, 4  ;;  %p1161_p3 = pnand %p740_p1, %p253_p2  ;;  %s1159_s11 = int_to_ptr.vmem [resolvable:$true] %s219_s11 }
  0x20   : > { %p1171_p5 = pneg %p1145_p0 }
  0x21   : > { %s1417_s19 = scalar_select %p1161_p3, 1, 0 }
  0x22   : > { %s1155_s9 = scalar_lea.hbm %s1416_s1, %s1141_s30  ;;  %s863_s8 = scalar_lea.hbm %s1416_s1, 1536 }
  0x23   : > { %s858_s22 = scalar_lea.hbm %s1155_s9, 768  ;;  %p864_p10 = scmp.lt.u32.totalorder %s1155_s9, %s1416_s1 }
  0x24   : > { %p859_p4 = scmp.ne.s32.totalorder %s1155_s9, %s858_s22  ;;  %p865_p13 = scmp.lt.u32.totalorder %s863_s8, %s858_s22 }
  0x25   : > { %p867_p2 = scmp.lt.u32.totalorder %s858_s22, %s1155_s9 }
  0x26   : > { %p861_p6 = pnand %p1171_p5, %p859_p4  ;;  %p866_p1 = por %p865_p13, %p864_p10 }
  0x28   : > { %p862_p7 = pneg %p861_p6  ;;  %p868_p12 = por %p867_p2, %p866_p1 }
  0x2a   : > { %p869_p11 = pnand %p868_p12, %p862_p7 }
  0x2c   : > { %872 = shalt.err (!%p869_p11)
}
  0x2d   : > { %s873_s5 = scalar_lea.vmem %s1159_s11, 768  ;;  %s1036_s6 = smov [#allocation5]  }
  0x2e   : > { %p874_p4 = scmp.ne.s32.totalorder %s1159_s11, %s873_s5  ;;  %s878_s7 = sshll.u32 %s1036_s6, 4  ;;  %s879_s7 = int_to_ptr.vmem [resolvable:$false] %s878_s7 }
  0x2f   : > { %s880_s29 = scalar_lea.vmem %s879_s7, 1536  ;;  %p881_p8 = scmp.lt.s32.totalorder %s1159_s11, %s879_s7 }
  0x30   : > { %p876_p6 = pnand %p874_p4, %p1171_p5  ;;  %p882_p3 = scmp.lt.s32.totalorder %s880_s29, %s873_s5 }
  0x32   : > { %p877_p9 = pneg %p876_p6  ;;  %p883_p10 = por %p882_p3, %p881_p8 }
  0x34   : > { %p884_p13 = pnand %p883_p10, %p877_p9 }
  0x36   : > { %887 = shalt.err (!%p884_p13)
}
  0x37   : > { %s1404_s22 = smov 128   ;;  %s1038_s8 = smov 8  }
  0x38   : > { %783 = dma.hbm_to_vmem [thread:$0]  (!%p1145_p0), %s1155_s9, 768, %s1159_s11, %s1165_s21, %s1404_s22, %s1404_s22, %s1038_s8  }
  0x39   : > { %s1419_s0 = sld [smem:[#allocation15_spill]]  ;;  %s1420_s7 = smul.u32 24, %s1137_s28 }
  0x3a   : > { %s181_s20 = scalar_lea.sflag [#allocation3], %s1137_s28 }
  0x3b   : > { %s184_s29 = scalar_lea.vmem [#allocation2], %s1420_s7 }
  0x3c   : > { %s196_s1 = sshll.u32 %s184_s29, 4  ;;  %s1206_s1 = int_to_ptr.vmem [resolvable:$true] %s196_s1 }
  0x3f   : > { %s1202_s6 = scalar_lea.hbm %s1419_s0, %s1141_s30  ;;  %s893_s10 = scalar_lea.hbm %s1419_s0, 1536 }
  0x40   : > { %s888_s16 = scalar_lea.hbm %s1202_s6, 384  ;;  %p894_p12 = scmp.lt.u32.totalorder %s1202_s6, %s1419_s0 }
  0x41   : > { %p889_p8 = scmp.ne.s32.totalorder %s1202_s6, %s888_s16  ;;  %p895_p3 = scmp.lt.u32.totalorder %s893_s10, %s888_s16 }
  0x42   : > { %p897_p1 = scmp.lt.u32.totalorder %s888_s16, %s1202_s6 }
  0x43   : > { %p891_p9 = pnand %p889_p8, %p1171_p5  ;;  %p896_p7 = por %p895_p3, %p894_p12 }
  0x45   : > { %p892_p11 = pneg %p891_p9  ;;  %p898_p2 = por %p897_p1, %p896_p7 }
  0x47   : > { %p899_p4 = pnand %p898_p2, %p892_p11 }
  0x49   : > { %902 = shalt.err (!%p899_p4)
}
  0x4a   : > { %s903_s7 = scalar_lea.vmem %s1206_s1, 384  ;;  %s1039_s29 = smov [#allocation2]  }
  0x4b   : > { %p904_p6 = scmp.ne.s32.totalorder %s1206_s1, %s903_s7  ;;  %s908_s9 = sshll.u32 %s1039_s29, 4  ;;  %s909_s9 = int_to_ptr.vmem [resolvable:$false] %s908_s9 }
  0x4c   : > { %s910_s22 = scalar_lea.vmem %s909_s9, 768  ;;  %p911_p8 = scmp.lt.s32.totalorder %s1206_s1, %s909_s9 }
  0x4d   : > { %p906_p10 = pnand %p904_p6, %p1171_p5  ;;  %p912_p9 = scmp.lt.s32.totalorder %s910_s22, %s903_s7 }
  0x4f   : > { %p907_p13 = pneg %p906_p10  ;;  %p913_p12 = por %p912_p9, %p911_p8 }
  0x51   : > { %p914_p3 = pnand %p913_p12, %p907_p13 }
  0x53   : > { %917 = shalt.err (!%p914_p3)
}
  0x54   : > { %s1040_s16 = smov 256   ;;  %s1421_s11 = smov 128  }
  0x55   : > { %780 = dma.hbm_to_vmem [thread:$0]  (!%p1145_p0), %s1202_s6, 384, %s1206_s1, %s181_s20, %s1040_s16, %s1421_s11, %s1038_s8  }
  0x56   : > { %s760_s10 = sadd.s32 128, %s1141_s30  ;;  %s1422_s5 = smul.u32 24, %s1137_s28 }
  0x57   : > { %s1241_s0 = scalar_lea.hbm %s1398_s2, %s760_s10  ;;  %s923_s28 = scalar_lea.hbm %s1398_s2, 1536 }
  0x58   : > { %s233_s7 = scalar_lea.vmem [#allocation7], %s1422_s5  ;;  %s918_s26 = scalar_lea.hbm %s1241_s0, 384 }
  0x59   : > { %s245_s29 = sshll.u32 %s233_s7, 4  ;;  %p919_p11 = scmp.ne.s32.totalorder %s1241_s0, %s918_s26  ;;  %s1243_s29 = int_to_ptr.vmem [resolvable:$true] %s245_s29 }
  0x5a   : > { %p924_p2 = scmp.lt.u32.totalorder %s1241_s0, %s1398_s2  ;;  %p925_p4 = scmp.lt.u32.totalorder %s923_s28, %s918_s26 }
  0x5b   : > { %p921_p7 = pnand %p919_p11, %p1171_p5  ;;  %p927_p10 = scmp.lt.u32.totalorder %s918_s26, %s1241_s0 }
  0x5c   : > { %p926_p6 = por %p925_p4, %p924_p2 }
  0x5d   : > { %p922_p1 = pneg %p921_p7 }
  0x5e   : > { %p928_p13 = por %p927_p10, %p926_p6 }
  0x60   : > { %p929_p8 = pnand %p928_p13, %p922_p1 }
  0x62   : > { %932 = shalt.err (!%p929_p8)
}
  0x63   : > { %s933_s10 = scalar_lea.vmem %s1243_s29, 384  ;;  %s1041_s5 = smov [#allocation7]  }
  0x64   : > { %p934_p9 = scmp.ne.s32.totalorder %s1243_s29, %s933_s10  ;;  %s938_s7 = sshll.u32 %s1041_s5, 4  ;;  %s939_s7 = int_to_ptr.vmem [resolvable:$false] %s938_s7 }
  0x65   : > { %s940_s9 = scalar_lea.vmem %s939_s7, 768  ;;  %p941_p11 = scmp.lt.s32.totalorder %s1243_s29, %s939_s7 }
  0x66   : > { %p936_p12 = pnand %p934_p9, %p1171_p5  ;;  %p942_p7 = scmp.lt.s32.totalorder %s940_s9, %s933_s10 }
  0x68   : > { %p937_p3 = pneg %p936_p12  ;;  %p943_p2 = por %p942_p7, %p941_p11 }
  0x6a   : > { %p944_p4 = pnand %p943_p2, %p937_p3 }
  0x6c   : > { %947 = shalt.err (!%p944_p4)
}
  0x6d   : > { %786 = dma.hbm_to_vmem [thread:$0]  (!%p1145_p0), %s1241_s0, 384, %s1243_s29, %s1165_s21, %s1040_s16, %s1421_s11, %s1038_s8  }
  0x6e   : > { %p1423_p5 = scmp.ne.s32.totalorder %s1417_s19, 0 }
  0x6f   : > { %s1273_s26 = sand.u32 (!%p1423_p5), 1, %s1018_s13   ;;  %p1424_p1 = scmp.ne.s32.totalorder (!%p1423_p5), %s1411_s24, 0 }
  0x70   : > { %257 = sbr.rel (%p1423_p5) target bundleno = 313 (0x139), region = 32  ;;  %s260_s23 = scalar_lea.sflag (!%p1423_p5), [#allocation3], %s1273_s26 }
  0x77   : > { %1001 = dma.done.wait (%p1424_p1), %s260_s23, 384  }
  0x78   : > { %1003 = vsyncadd (%p1424_p1), %s260_s23, 4294966912  ;;  %s268_s4 = sand.u32 1, %s1099_s18   ;;  %s768_s22 = smul.u32 48, %s1273_s26 }
  0x79   : > { %s269_s0 = scalar_lea.sflag [#allocation6], %s268_s4 }
  0x7a   : > { %s272_s21 = scalar_lea.vmem [#allocation5], %s768_s22 }
  0x7b   : > { %1005 = dma.done.wait (%p1424_p1), %s269_s0, 1152  }
  0x7c   : > { %1007 = vsyncadd (%p1424_p1), %s269_s0, 4294966144  ;;  %v1286_v0 = vld [vmem:[%s272_s21] sm:$0xff]  ;;  %v1288_v1 = vld [vmem:[%s272_s21 + $0x8] sm:$0xff]  ;;  %v520_v48 = vlaneseq  ;;  %v1042_v58 = vmov 0.0   ;;  %s1043_s18 = smov 127   ;;  %s1044_s24 = smov 1  }
  0x7d   : > { %v742_v2 = vld [vmem:[%s272_s21 + $0x10] sm:$0xff]  ;;  %v1290_v3 = vld [vmem:[%s272_s21 + $0x18] sm:$0xff]  ;;  %v744_v4 = vld [vmem:[%s272_s21 + $0x20] sm:$0xff]  ;;  %s741_s19 = sshll.u32 %s1273_s26, 4  ;;  %s761_s11 = sshll.u32 %s1026_s15, 8 }
  0x7e   : > { %v745_v5 = vld [vmem:[%s272_s21 + $0x28] sm:$0xff]  ;;  %v332_v6 = vmax.f32 %v1286_v0, %v742_v2  ;;  %v336_v7 = vmin.f32 %v1286_v0, %v742_v2  ;;  %v333_v8 = vmax.f32 %v1288_v1, %v1290_v3  ;;  %v337_v9 = vmin.f32 %v1288_v1, %v1290_v3  ;;  %s313_s8 = scalar_lea.vmem [#allocation8], %s741_s19  ;;  %s1347_s20 = scalar_lea.hbm %s1399_s3, %s761_s11 }
  0x7f   : > { %v354_v20 = vsub.f32 %v742_v2, %v744_v4  ;;  %v364_v21 = vsub.f32 %v744_v4, %v1286_v0  ;;  %v370_v22 = vsub.f32 %v1286_v0, %v742_v2  ;;  %v355_v24 = vsub.f32 %v1290_v3, %v745_v5  ;;  %s599_s16 = sshll.u32 %s313_s8, 4  ;;  %s584_s28 = scalar_lea.sflag [#allocation4], %s1273_s26  ;;  %s1342_s16 = int_to_ptr.vmem [resolvable:$true] %s599_s16 }
  0x80   : > { %v1298_v10 = vmax.f32 %v332_v6, %v744_v4  ;;  %v338_v11 = vmin.f32 %v336_v7, %v744_v4  ;;  %v1300_v12 = vmax.f32 %v333_v8, %v745_v5  ;;  %v339_v13 = vmin.f32 %v337_v9, %v745_v5  ;;  %s948_s30 = scalar_lea.vmem %s1342_s16, 256  ;;  %p1425_p6 = scmp.ne.s32.totalorder %s1412_s25, 0 }
  0x81   : > { %v365_v25 = vsub.f32 %v745_v5, %v1288_v1  ;;  %v371_v26 = vsub.f32 %v1288_v1, %v1290_v3  ;;  %v521_v55 = vshrl.u32 %v520_v48, 7  ;;  %p949_p0 = scmp.ne.s32.totalorder %s1342_s16, %s948_s30  ;;  %s1045_s15 = smov [#allocation8]  }
  0x82   : > { %v340_v14 = vsub.f32 %v1298_v10, %v338_v11  ;;  %v348_v15 = vadd.f32 1e-08, %v1298_v10  ;;  %v341_v16 = vsub.f32 %v1300_v12, %v339_v13  ;;  %v349_v17 = vadd.f32 1e-08, %v1300_v12  ;;  %s952_s6 = sshll.u32 %s1045_s15, 4  ;;  %s953_s6 = int_to_ptr.vmem [resolvable:$false] %s952_s6 }
  0x83   : > { %vm388_vm0 = vcmp.eq.f32.partialorder %v1298_v10, 0.0  ;;  %vm376_vm1 = vcmp.eq.f32.partialorder %v742_v2, %v1298_v10  ;;  %vm380_vm2 = vcmp.eq.f32.partialorder %v1286_v0, %v1298_v10  ;;  %vm389_vm3 = vcmp.eq.f32.partialorder %v1300_v12, 0.0  ;;  %p950_p10 = pnand %p949_p0, %p1425_p6  ;;  %s954_s10 = scalar_lea.vmem %s953_s6, 512 }
  0x84   : > { %v342_v18 = vadd.f32 1e-08, %v340_v14  ;;  %850 = vrcp.f32 %v348_v15  ;;  %v343_v19 = vadd.f32 1e-08, %v341_v16  ;;  %vm377_vm4 = vcmp.eq.f32.partialorder %v1290_v3, %v1300_v12  ;;  %p955_p8 = scmp.lt.s32.totalorder %s1342_s16, %s953_s6  ;;  %p956_p9 = scmp.lt.s32.totalorder %s954_s10, %s948_s30 }
  0x85   : > { %852 = vrcp.f32 %v349_v17  ;;  %vm381_vm5 = vcmp.eq.f32.partialorder %v1288_v1, %v1300_v12  ;;  %vm384_vm6 = vcmp.eq.f32.partialorder %v338_v11, %v1298_v10  ;;  %vm385_vm9 = vcmp.eq.f32.partialorder %v339_v13, %v1300_v12  ;;  %p951_p13 = pneg %p950_p10 }
  0x86   : > { %854 = vrcp.f32 %v342_v18  ;;  %v532_v56 = vsub.s32 0, %v521_v55  ;;  %v522_v57 = vadd.s32 8, %v521_v55  ;;  %p957_p12 = por %p956_p9, %p955_p8 }
  0x87   : > { %856 = vrcp.f32 %v343_v19 }
  0x88   : > { %v533_v62 = vrot.slane %v1042_v58, %v532_v56  ;;  %p958_p3 = pnand %p957_p12, %p951_p13 }
  0x8e   : > { %v851_v23 = vpop.eup %850 }
  0x8f   : > { %v853_v27 = vpop.eup %852  ;;  %v390_v28 = vmul.f32 %v851_v23, %v340_v14 }
  0x90   : > { %v855_v29 = vpop.eup %854  ;;  %v391_v30 = vmul.f32 %v853_v27, %v341_v16  ;;  %v558_v16 = vand.u32 127, %v520_v48 }
  0x91   : > { %v857_v31 = vpop.eup %856  ;;  %v356_v32 = vmul.f32 %v855_v29, %v354_v20  ;;  %v366_v33 = vmul.f32 %v855_v29, %v364_v21  ;;  %v372_v34 = vmul.f32 %v855_v29, %v370_v22  ;;  %v392_v35 = vsel %vm388_vm0, 0.0, %v390_v28 }
  0x92   : > { %v357_v36 = vmul.f32 %v857_v31, %v355_v24  ;;  %v367_v37 = vmul.f32 %v857_v31, %v365_v25  ;;  %v373_v38 = vmul.f32 %v857_v31, %v371_v26  ;;  %v393_v39 = vsel %vm389_vm3, 0.0, %v391_v30 }
  0x93   : > { %vm358_vm7 = vcmp.lt.f32.partialorder %v356_v32, 0.0  ;;  %v360_v40 = vadd.f32 6.0, %v356_v32  ;;  %v368_v41 = vadd.f32 2.0, %v366_v33  ;;  %v374_v42 = vadd.f32 4.0, %v372_v34 }
  0x94   : > { %vm359_vm8 = vcmp.lt.f32.partialorder %v357_v36, 0.0  ;;  %v361_v43 = vadd.f32 6.0, %v357_v36  ;;  %v369_v44 = vadd.f32 2.0, %v367_v37  ;;  %v375_v45 = vadd.f32 4.0, %v373_v38 }
  0x95   : > { %v362_v46 = vsel %vm358_vm7, %v360_v40, %v356_v32  ;;  %v378_v47 = vsel %vm376_vm1, %v368_v41, %v374_v42  ;;  %vm396_vm10 = vcmp.ge.f32.partialorder %v392_v35, 0.43137255  ;;  %vm397_vm11 = vcmp.ge.f32.partialorder %v393_v39, 0.43137255 }
  0x96   : > { %v363_v49 = vsel %vm359_vm8, %v361_v43, %v357_v36  ;;  %v379_v50 = vsel %vm377_vm4, %v369_v44, %v375_v45  ;;  %v382_v51 = vsel %vm380_vm2, %v362_v46, %v378_v47  ;;  %vm400_vm13 = vcmp.le.f32.partialorder %v392_v35, 1.0 }
  0x97   : > { %v383_v52 = vsel %vm381_vm5, %v363_v49, %v379_v50  ;;  %v386_v53 = vsel %vm384_vm6, 0.0, %v382_v51  ;;  %vm401_vm0 = vcmp.le.f32.partialorder %v393_v39, 1.0  ;;  %vm404_vm3 = vcmp.ge.f32.partialorder %v1298_v10, 0.43137255 }
  0x98   : > { %v387_v54 = vsel %vm385_vm9, 0.0, %v383_v52  ;;  %vm394_vm12 = vcmp.lt.f32.partialorder %v386_v53, 0.32941177  ;;  %vm405_vm4 = vcmp.ge.f32.partialorder %v1300_v12, 0.43137255  ;;  %vm408_vm5 = vcmp.le.f32.partialorder %v1298_v10, 1.0 }
  0x99   : > { %vm395_vm14 = vcmp.lt.f32.partialorder %v387_v54, 0.32941177  ;;  %vm398_vm15 = vmand %vm394_vm12, %vm396_vm10  ;;  %vm409_vm6 = vcmp.le.f32.partialorder %v1300_v12, 1.0 }
  0x9a   : > { %vm399_vm1 = vmand %vm395_vm14, %vm397_vm11  ;;  %vm527_vm11 = vcmp.lt.s32.totalorder %v521_v55, 1  ;;  %vm540_vm14 = vcmp.lt.s32.totalorder %v521_v55, 7 }
  0x9b   : > { %vm402_vm2 = vmand %vm398_vm15, %vm400_vm13  ;;  %vm523_vm13 = vcmp.eq.s32.totalorder %v521_v55, 0  ;;  %vm537_vm15 = vcmp.eq.s32.totalorder %v522_v57, 15 }
  0x9c   : > { %vm403_vm7 = vmand %vm399_vm1, %vm401_vm0  ;;  %vm566_vm0 = vcmp.eq.s32.totalorder %v558_v16, 127  ;;  %vm559_vm1 = vcmp.eq.s32.totalorder %v558_v16, 0 }
  0x9d   : > { %vm406_vm8 = vmand %vm402_vm2, %vm404_vm3 }
  0x9e   : > { %vm407_vm9 = vmand %vm403_vm7, %vm405_vm4 }
  0x9f   : > { %vm410_vm10 = vmand %vm406_vm8, %vm408_vm5 }
  0xa0   : > { %vm411_vm12 = vmand %vm407_vm9, %vm409_vm6  ;;  %v746_v59 = vsel %vm410_vm10, 1.0, %v1042_v58 }
  0xa1   : > { %v747_v60 = vsel %vm411_vm12, 1.0, %v1042_v58  ;;  %v525_v61 = vrot.slane %v746_v59, 7  ;;  %v538_v63 = vrot.slane %v746_v59, 1  ;;  %v549_v8 = vmul.f32 0.5, %v746_v59 }
  0xa2   : > { %v526_v0 = vrot.slane %v747_v60, 7  ;;  %v539_v1 = vrot.slane %v747_v60, 1  ;;  %v550_v12 = vmul.f32 0.5, %v747_v60 }
  0xa4   : > { %v529_v2 = vsel %vm527_vm11, %v526_v0, %v525_v61  ;;  %v541_v3 = vsel %vm540_vm14, %v538_v63, %v539_v1  ;;  %v528_v4 = vsel %vm527_vm11, %v525_v61, %v526_v0  ;;  %v542_v5 = vsel %vm540_vm14, %v539_v1, %v538_v63 }
  0xa5   : > { %v534_v6 = vsel %vm523_vm13, %v533_v62, %v529_v2  ;;  %v548_v7 = vsel %vm537_vm15, %v533_v62, %v542_v5 }
  0xa6   : > { %v551_v9 = vadd.f32 %v541_v3, %v534_v6  ;;  %v552_v10 = vadd.f32 %v548_v7, %v528_v4 }
  0xa8   : > { %v553_v11 = vmul.f32 0.25, %v551_v9  ;;  %v554_v13 = vmul.f32 0.25, %v552_v10 }
  0xaa   : > { %v555_v14 = vadd.f32 %v553_v11, %v549_v8  ;;  %v556_v15 = vadd.f32 %v554_v13, %v550_v12 }
  0xac   : > { %567 = vrot.lane.b32.xlu1 %v555_v14, %s1043_s18  ;;  %560 = vrot.lane.b32.xlu0 %v555_v14, %s1044_s24  ;;  %v573_v21 = vmul.f32 0.5, %v555_v14  ;;  %v574_v29 = vmul.f32 0.5, %v556_v15 }
  0xb0   : > { %569 = vrot.lane.b32.xlu1 %v556_v15, %s1043_s18  ;;  %562 = vrot.lane.b32.xlu0 %v556_v15, %s1044_s24 }
 0x11e   : > { %v568_v17 = vpop.permute.xlu1 %567  ;;  %v561_v18 = vpop.permute.xlu0 %560 }
 0x11f   : > { %v571_v19 = vsel %vm566_vm0, 0.0, %v568_v17  ;;  %v564_v20 = vsel %vm559_vm1, 0.0, %v561_v18 }
 0x120   : > { %v575_v22 = vadd.f32 %v571_v19, %v564_v20 }
 0x122   : > { %v577_v23 = vmul.f32 0.25, %v575_v22  ;;  %v570_v24 = vpop.permute.xlu1 %569  ;;  %v563_v25 = vpop.permute.xlu0 %562 }
 0x123   : > { %v572_v26 = vsel %vm566_vm0, 0.0, %v570_v24  ;;  %v565_v27 = vsel %vm559_vm1, 0.0, %v563_v25 }
 0x124   : > { %v579_v28 = vadd.f32 %v577_v23, %v573_v21  ;;  %v576_v30 = vadd.f32 %v572_v26, %v565_v27 }
 0x126   : > { %581 = vst [vmem:[%s313_s8] sm:$0xff] %v579_v28  ;;  %v578_v31 = vmul.f32 0.25, %v576_v30 }
 0x128   : > { %v580_v32 = vadd.f32 %v578_v31, %v574_v29 }
 0x12a   : > { %582 = vst [vmem:[%s313_s8 + $0x8] sm:$0xff] %v580_v32 }
 0x12b   : > { %961 = shalt.err (!%p958_p3)
}
 0x12c   : > { %s962_s5 = scalar_lea.hbm %s1347_s20, 256  ;;  %s966_s23 = scalar_lea.hbm %s1399_s3, 512 }
 0x12d   : > { %p963_p11 = scmp.ne.s32.totalorder %s1347_s20, %s962_s5  ;;  %p967_p4 = scmp.lt.u32.totalorder %s1347_s20, %s1399_s3 }
 0x12e   : > { %p968_p5 = scmp.lt.u32.totalorder %s966_s23, %s962_s5  ;;  %p970_p0 = scmp.lt.u32.totalorder %s962_s5, %s1347_s20 }
 0x12f   : > { %p964_p7 = pnand %p963_p11, %p1425_p6 }
 0x130   : > { %p969_p1 = por %p968_p5, %p967_p4 }
 0x131   : > { %p965_p2 = pneg %p964_p7 }
 0x132   : > { %p971_p10 = por %p970_p0, %p969_p1 }
 0x134   : > { %p972_p13 = pnand %p971_p10, %p965_p2 }
 0x136   : > { %975 = shalt.err (!%p972_p13)
}
 0x137   : > { %s1046_s0 = smov 128   ;;  %s1047_s21 = smov 8  }
 0x138   : > { %775 = dma.vmem_to_hbm [thread:$0]  (%p1425_p6), %s1342_s16, 256, %s1347_s20, %s584_s28, %s1046_s0, %s1046_s0, %s1047_s21  }
 0x139 PF: > { %s614_s18 = sand.u32 1, %s1014_s12   ;;  %p1426_p8 = scmp.ne.s32.totalorder %s1414_s27, 0 }
 0x13a   : > { %p1427_p9 = scmp.ge.s32.totalorder %s1034_s17, 2  ;;  %s615_s24 = scalar_lea.sflag [#allocation4], %s614_s18 }
 0x13c   : > { %p788_p12 = pnand %p1427_p9, %p1426_p8 }
 0x13e   : > { %1009 = dma.done.wait (!%p788_p12), %s615_s24, 256  }
 0x13f   : > { %1011 = vsyncadd (!%p788_p12), %s615_s24, 4294967040  ;;  %s22_s17 = sadd.s32 1, %s1034_s17   ;;  %s1428_s19 = sld [smem:[#allocation14_spill]] }
 0x140   : > { %p19_p3 = scmp.ge.s32.totalorder %s22_s17, 4   ;;  %s1429_s15 = sld [smem:[#allocation12_spill]] }
 0x141   : > { %s1430_s16 = sld [smem:[#allocation13_spill]]  ;;  %s1431_s12 = smov %s1018_s13 }
 0x142   : > { %s1432_s13 = smov %s1022_s14  ;;  %21 = sbr.rel (!%p19_p3) target bundleno = 11 (0xb), region = 107 }
 0x145   : > { %s1433_s14 = smov %s1428_s19 }
 0x149   :  { %620 = vsyncpa [#allocation3], 1 }
 0x14a   :  { %622 = vsyncpa [#allocation3 + $0x1], 1 }
 0x14b   :  { %623 = vsyncpa [#allocation6], 1 }
 0x14c   :  { %625 = vsyncpa [#allocation6 + $0x1], 1 }
 0x14d   :  { %626 = vsyncpa [#allocation4], 1 }
 0x14e   :  { %628 = vsyncpa [#allocation4 + $0x1], 1 }

</bundles_post_ra>
